<compile_context>
chip_gen: v6e
topology: v6e:2x2x1
jax: 0.10.0
libtpu: 0.0.40
codegen_flags: <defaults>
</compile_context>

<pallas_src>
import functools

import jax
import jax.numpy as jnp
from jax.experimental import pallas as pl
from jax.experimental.pallas import tpu as pltpu


def _round_up(v: int, m: int) -> int:
    return (v + m - 1) // m * m


# ---------------------------------------------------------------------------
# Capability probes (run eagerly once, cached; primed in __main__ before jit).
# ---------------------------------------------------------------------------
@functools.lru_cache(maxsize=None)
def _single_buffer_mode():
    """pl.Buffered(1) if this JAX build supports single-buffered BlockSpecs, else None."""
    try:
        spec = pl.BlockSpec((8, 128), lambda i: (0, 0), pipeline_mode=pl.Buffered(1))

        def _probe(x_ref, o_ref):
            o_ref[...] = x_ref[...] + 1.0

        out = pl.pallas_call(
            _probe,
            out_shape=jax.ShapeDtypeStruct((8, 128), jnp.float32),
            grid=(1,),
            in_specs=[spec],
            out_specs=pl.BlockSpec((8, 128), lambda i: (0, 0)),
        )(jnp.zeros((8, 128), jnp.float32))
        jax.block_until_ready(out)
        return pl.Buffered(1)
    except Exception:
        return None


@functools.lru_cache(maxsize=None)
def _vmem_limit_bytes() -> int:
    """~85% of this generation's VMEM (64 MiB on v7x, 128 MiB on v5e/v6e)."""
    try:
        cap = int(pltpu.get_tpu_info().vmem_capacity_bytes)
    except Exception:
        cap = 64 * 1024 * 1024           # conservative fallback (v7x-sized)
    return max(32 * 1024 * 1024, min(int(cap * 0.85), 110 * 1024 * 1024))


def _resident_spec(block_shape, index_map):
    """BlockSpec for an operand that stays in VMEM for the whole grid."""
    mode = _single_buffer_mode()
    if mode is not None:
        return pl.BlockSpec(block_shape, index_map, pipeline_mode=mode)
    return pl.BlockSpec(block_shape, index_map)


# ---------------------------------------------------------------------------
# Fused kernel.  Grid step l:
#   H <- ReLU( (A_hat @ H) @ W_l + b_l )      (GCNConv + ReLU, dropout=identity)
# and on the last step additionally:
#   pooled = P @ H ; ffn = ReLU(pooled @ W_ffn + b_ffn) ; soft = softmax(ffn)
# ---------------------------------------------------------------------------
def _fused_gcn_gap_kernel(a_ref, x_ref, w_ref, b_ref, p_ref, wf_ref, bf_ref,
                          hid_ref, pooled_ref, ffn_ref, soft_ref,
                          h_scratch, *, output_dim):
    layer = pl.program_id(0)
    last = pl.num_programs(0) - 1

    @pl.when(layer == 0)
    def _():
        h_scratch[...] = x_ref[...]

    # (A_hat @ H) @ W with bf16 MXU operands and f32 accumulation.
    agg = jnp.dot(a_ref[...], h_scratch[...], preferred_element_type=jnp.float32)
    new_h = jnp.dot(agg.astype(jnp.bfloat16), w_ref[0],
                    preferred_element_type=jnp.float32) + b_ref[0]
    new_h = jnp.maximum(new_h, 0.0)                       # ReLU kept in f32 (VPU)
    new_h_bf16 = new_h.astype(jnp.bfloat16)

    @pl.when(layer < last)
    def _():
        h_scratch[...] = new_h_bf16                       # carry; skipped on last layer

    hid_ref[0] = new_h_bf16                               # lane-dense bf16 layer export

    @pl.when(layer == last)
    def _():
        pooled = jnp.dot(p_ref[...], new_h_bf16, preferred_element_type=jnp.float32)
        ffn = jnp.dot(pooled, wf_ref[...],
                      preferred_element_type=jnp.float32) + bf_ref[...]
        ffn = jnp.maximum(ffn, 0.0)
        # Softmax (f32) over the real output_dim columns only (rest is lane padding).
        col = jax.lax.broadcasted_iota(jnp.int32, ffn.shape, 1)
        valid = col < output_dim
        neg = jnp.finfo(jnp.float32).min
        m = jnp.max(jnp.where(valid, ffn, neg), axis=1, keepdims=True)
        e = jnp.where(valid, jnp.exp(ffn - m), 0.0)
        soft = e * pl.reciprocal(jnp.sum(e, axis=1, keepdims=True), approx=False)
        pooled_ref[...] = pooled
        ffn_ref[...] = ffn                                # padded cols are exactly 0
        soft_ref[...] = soft


def fused_gcn_gap_call(a_pad, x_pad, w_stack, b_stack, p_pad, wf_pad, bf_pad,
                       output_dim):
    num_layers, d_feat, _ = w_stack.shape
    n_pad = a_pad.shape[0]
    g_pad = p_pad.shape[0]
    d_out = wf_pad.shape[1]

    grid_spec = pltpu.PrefetchScalarGridSpec(
        num_scalar_prefetch=0,
        grid=(num_layers,),
        in_specs=[
            _resident_spec((n_pad, n_pad), lambda l: (0, 0)),         # A_hat (bf16, resident)
            _resident_spec((n_pad, d_feat), lambda l: (0, 0)),        # X0    (bf16, resident)
            pl.BlockSpec((1, d_feat, d_feat), lambda l: (l, 0, 0)),   # W_l   (bf16, streamed)
            pl.BlockSpec((1, 1, d_feat), lambda l: (l, 0, 0)),        # b_l   (f32,  streamed)
            _resident_spec((g_pad, n_pad), lambda l: (0, 0)),         # P     (bf16, resident)
            _resident_spec((d_feat, d_out), lambda l: (0, 0)),        # W_ffn (f32,  resident)
            _resident_spec((1, d_out), lambda l: (0, 0)),             # b_ffn (f32,  resident)
        ],
        out_specs=(
            pl.BlockSpec((1, n_pad, d_feat), lambda l: (l, 0, 0)),    # per-layer H (bf16)
            pl.BlockSpec((g_pad, d_feat), lambda l: (0, 0)),          # pooled  (f32)
            pl.BlockSpec((g_pad, d_out), lambda l: (0, 0)),           # ffn     (f32)
            pl.BlockSpec((g_pad, d_out), lambda l: (0, 0)),           # softmax (f32)
        ),
        scratch_shapes=[pltpu.VMEM((n_pad, d_feat), jnp.bfloat16)],
    )

    flops = (2 * num_layers * (n_pad * n_pad * d_feat + n_pad * d_feat * d_feat)
             + 2 * g_pad * n_pad * d_feat + 2 * g_pad * d_feat * d_out)
    bytes_accessed = (
        2 * (a_pad.size + x_pad.size + w_stack.size + p_pad.size)        # bf16 inputs
        + 4 * (b_stack.size + wf_pad.size + bf_pad.size)                 # f32 inputs
        + 2 * num_layers * n_pad * d_feat                                # bf16 hid out
        + 4 * (g_pad * d_feat + 2 * g_pad * d_out))                      # f32 outputs
    cost = pl.CostEstimate(flops=flops, transcendentals=g_pad * d_out,
                           bytes_accessed=bytes_accessed)

    return pl.pallas_call(
        functools.partial(_fused_gcn_gap_kernel, output_dim=output_dim),
        out_shape=(
            jax.ShapeDtypeStruct((num_layers, n_pad, d_feat), jnp.bfloat16),
            jax.ShapeDtypeStruct((g_pad, d_feat), jnp.float32),
            jax.ShapeDtypeStruct((g_pad, d_out), jnp.float32),
            jax.ShapeDtypeStruct((g_pad, d_out), jnp.float32),
        ),
        grid_spec=grid_spec,
        cost_estimate=cost,
        compiler_params=pltpu.CompilerParams(
            dimension_semantics=("arbitrary",),           # layers are truly sequential
            vmem_limit_bytes=_vmem_limit_bytes(),
        ),
    )(a_pad, x_pad, w_stack, b_stack, p_pad, wf_pad, bf_pad)


# ---------------------------------------------------------------------------
# Plain-JAX glue: graph preprocessing, padding, parameter init
# ---------------------------------------------------------------------------
def gcn_normalized_adjacency(edge_index, num_nodes):
    """Dense D^{-1/2}(A+I)D^{-1/2}, matching PyG gcn_norm (self-loops, scatter-add)."""
    src, dst = edge_index[0], edge_index[1]
    adj = jnp.zeros((num_nodes, num_nodes), jnp.float32)
    adj = adj.at[dst, src].add(1.0)                         # duplicate edges sum
    adj = adj + jnp.eye(num_nodes, dtype=jnp.float32)       # self loops
    deg = jnp.sum(adj, axis=1)
    d_inv_sqrt = jnp.where(deg > 0, 1.0 / jnp.sqrt(deg), 0.0)
    return d_inv_sqrt[:, None] * adj * d_inv_sqrt[None, :]


def mean_pool_matrix(batch, num_graphs, num_nodes):
    """P[g, n] = 1/count_g if batch[n] == g else 0  ->  P @ X = global_mean_pool."""
    one_hot = (batch[None, :] == jnp.arange(num_graphs)[:, None]).astype(jnp.float32)
    counts = jnp.maximum(jnp.sum(one_hot, axis=1, keepdims=True), 1.0)
    return one_hot / counts


def xavier_normal(key, fan_in, fan_out):
    # torch.nn.init.xavier_normal_ (gain=1); stored pre-transposed [in, out].
    std = jnp.sqrt(2.0 / (fan_in + fan_out))
    return std * jax.random.normal(key, (fan_in, fan_out), jnp.float32)


def init_params(key, input_dim, hidden_dim, output_dim, num_hid_layers):
    keys = jax.random.split(key, num_hid_layers + 1)
    gconvs = []
    for layer in range(num_hid_layers):
        in_dim = input_dim if layer == 0 else hidden_dim
        w = xavier_normal(keys[layer], in_dim, hidden_dim)
        b = jnp.zeros((1, hidden_dim), jnp.float32)          # Bias=True, zero-init
        gconvs.append((w, b))
    w_ffn = xavier_normal(keys[-1], hidden_dim, output_dim)
    b_ffn = jnp.zeros((1, output_dim), jnp.float32)
    return gconvs, w_ffn, b_ffn


@functools.partial(jax.jit, static_argnames=("num_graphs",))
def gcn_plus_gap_forward(x, edge_index, batch, num_graphs, gconv_params,
                         w_ffn, b_ffn):
    """Returns (Output_of_Hidden_Layers, pooling_layer_output, ffn_output, soft)."""
    n, f = x.shape
    num_layers = len(gconv_params)
    hidden_dim = gconv_params[0][0].shape[1]
    output_dim = w_ffn.shape[1]

    d_feat = _round_up(max(f, hidden_dim), 128)   # lane dim of H / W
    d_out = _round_up(output_dim, 128)            # lane dim of FFN outputs
    n_pad = _round_up(n, 128)                     # lane dim of A_hat / P
    g_pad = _round_up(num_graphs, 8)              # sublane dim of pooled outputs

    a_hat = gcn_normalized_adjacency(edge_index, n)
    pool = mean_pool_matrix(batch, num_graphs, n)

    # bf16 MXU operands; f32 accumulation happens inside the kernel.
    a_pad = jnp.zeros((n_pad, n_pad), jnp.bfloat16).at[:n, :n].set(
        a_hat.astype(jnp.bfloat16))
    x_pad = jnp.zeros((n_pad, d_feat), jnp.bfloat16).at[:n, :f].set(
        x.astype(jnp.bfloat16))
    p_pad = jnp.zeros((g_pad, n_pad), jnp.bfloat16).at[:num_graphs, :n].set(
        pool.astype(jnp.bfloat16))

    w_stack = jnp.zeros((num_layers, d_feat, d_feat), jnp.bfloat16)
    b_stack = jnp.zeros((num_layers, 1, d_feat), jnp.float32)
    for layer, (w, b) in enumerate(gconv_params):
        w_stack = w_stack.at[layer, :w.shape[0], :w.shape[1]].set(w.astype(jnp.bfloat16))
        b_stack = b_stack.at[layer, :1, :b.shape[-1]].set(b.reshape(1, -1))

    wf_pad = jnp.zeros((d_feat, d_out), jnp.float32).at[:hidden_dim, :output_dim].set(w_ffn)
    bf_pad = jnp.zeros((1, d_out), jnp.float32).at[:1, :output_dim].set(b_ffn.reshape(1, -1))

    hid_pad, pooled_pad, ffn_pad, soft_pad = fused_gcn_gap_call(
        a_pad, x_pad, w_stack, b_stack, p_pad, wf_pad, bf_pad, output_dim)

    hidden_outputs = [hid_pad[layer, :n, :hidden_dim].astype(jnp.float32)
                      for layer in range(num_layers)]
    pooled = pooled_pad[:num_graphs, :hidden_dim]
    ffn_out = ffn_pad[:num_graphs, :output_dim]
    soft = soft_pad[:num_graphs, :output_dim]
    return hidden_outputs, pooled, ffn_out, soft


# ---------------------------------------------------------------------------
if __name__ == "__main__":
    # Small synthetic graph batch: 2 graphs x 8 nodes = 16 nodes.
    INPUT_DIM = 8
    HIDDEN_DIM = 32
    OUTPUT_DIM = 4
    NUM_HID_LAYERS = 2
    NUM_NODES = 16
    NUM_GRAPHS = 2
    NODES_PER_GRAPH = NUM_NODES // NUM_GRAPHS

    # Prime capability probes eagerly (outside the jit trace below).
    _single_buffer_mode()
    _vmem_limit_bytes()

    key = jax.random.PRNGKey(0)
    k_x, k_params = jax.random.split(key)
    x = jax.random.normal(k_x, (NUM_NODES, INPUT_DIM), jnp.float32)

    # Bidirectional chain within each graph.
    src, dst = [], []
    for g in range(NUM_GRAPHS):
        base = g * NODES_PER_GRAPH
        for i in range(NODES_PER_GRAPH - 1):
            src += [base + i, base + i + 1]
            dst += [base + i + 1, base + i]
    edge_index = jnp.array([src, dst], dtype=jnp.int32)
    batch = jnp.array(
        sum(([g] * NODES_PER_GRAPH for g in range(NUM_GRAPHS)), []), jnp.int32)

    gconv_params, w_ffn, b_ffn = init_params(
        k_params, INPUT_DIM, HIDDEN_DIM, OUTPUT_DIM, NUM_HID_LAYERS)

    hidden_outs, pooled, ffn_out, soft = gcn_plus_gap_forward(
        x, edge_index, batch, NUM_GRAPHS, gconv_params, w_ffn, b_ffn)

    for h in hidden_outs:
        jax.block_until_ready(h)
    pooled = jax.block_until_ready(pooled)
    ffn_out = jax.block_until_ready(ffn_out)
    soft = jax.block_until_ready(soft)

    # Pure-JAX f32 reference (loose tolerance: bf16 MXU operands + padding).
    a_hat = gcn_normalized_adjacency(edge_index, NUM_NODES)
    pool_mat = mean_pool_matrix(batch, NUM_GRAPHS, NUM_NODES)
    h_ref = x
    ref_hidden = []
    for (w, b) in gconv_params:
        h_ref = jnp.maximum(a_hat @ (h_ref @ w) + b, 0.0)
        ref_hidden.append(h_ref)
    ref_pooled = pool_mat @ h_ref
    ref_ffn = jnp.maximum(ref_pooled @ w_ffn + b_ffn, 0.0)
    ref_soft = jax.nn.softmax(ref_ffn, axis=1)

    assert soft.shape == (NUM_GRAPHS, OUTPUT_DIM)
    assert bool(jnp.all(jnp.abs(jnp.sum(soft, axis=1) - 1.0) < 1e-4))
    TOL = 5e-2
    assert bool(jnp.all(jnp.abs(hidden_outs[-1] - ref_hidden[-1]) < TOL))
    assert bool(jnp.all(jnp.abs(pooled - ref_pooled) < TOL))
    assert bool(jnp.all(jnp.abs(ffn_out - ref_ffn) < TOL))
    assert bool(jnp.all(jnp.abs(soft - ref_soft) < TOL))

    print("KERNEL_OK")
</pallas_src>

<mosaic_0001>
module attributes {stable_mosaic.version = 11 : i64} {
  func.func @_probe(%arg0: i32, %arg1: memref<8x128xf32, #tpu.memory_space<vmem>>, %arg2: memref<8x128xf32, #tpu.memory_space<vmem>>) attributes {dimension_semantics = [#tpu.dimension_semantics<arbitrary>], iteration_bounds = array<i64: 1>, scalar_prefetch = 0 : i64, scratch_operands = 0 : i64, tpu.core_type = #tpu.core_type<tc>, window_params = [{pipeline_mode = #tpu.pipeline_mode<synchronous>, transform_indices = @transform_0, window_bounds = array<i64: 8, 128>}, {pipeline_mode = #tpu.pipeline_mode<synchronous>, transform_indices = @transform_1, window_bounds = array<i64: 8, 128>}]} {
    %c0 = arith.constant 0 : index
    %c0_0 = arith.constant 0 : index
    %0 = vector.load %arg1[%c0, %c0_0] : memref<8x128xf32, #tpu.memory_space<vmem>>, vector<8x128xf32>
    %cst = arith.constant 1.000000e+00 : f32
    %1 = vector.broadcast %cst : f32 to vector<8x128xf32>
    %2 = arith.addf %0, %1 : vector<8x128xf32>
    %c0_1 = arith.constant 0 : index
    %c0_2 = arith.constant 0 : index
    %3 = vector.load %arg2[%c0_1, %c0_2] : memref<8x128xf32, #tpu.memory_space<vmem>>, vector<8x128xf32>
    tpu.vector_store %arg2[%c0_1, %c0_2], %2 {strides = array<i32>} : memref<8x128xf32, #tpu.memory_space<vmem>>, vector<8x128xf32>,
    return
  }
  func.func @transform_0(%arg0: i32) -> (i32, i32) {
    %c0_i32 = arith.constant 0 : i32
    %c0_i32_0 = arith.constant 0 : i32
    %c0_i32_1 = arith.constant 0 : i32
    return %c0_i32, %c0_i32_0 : i32, i32
  }
  func.func @transform_1(%arg0: i32) -> (i32, i32) {
    %c0_i32 = arith.constant 0 : i32
    %c0_i32_0 = arith.constant 0 : i32
    %c0_i32_1 = arith.constant 0 : i32
    return %c0_i32, %c0_i32_0 : i32, i32
  }
}

module attributes {stable_mosaic.version = 11 : i64} {
  func.func @_fused_gcn_gap_kernel(%arg0: i32, %arg1: memref<128x128xbf16, #tpu.memory_space<vmem>>, %arg2: memref<128x128xbf16, #tpu.memory_space<vmem>>, %arg3: memref<1x128x128xbf16, #tpu.memory_space<vmem>>, %arg4: memref<1x1x128xf32, #tpu.memory_space<vmem>>, %arg5: memref<8x128xbf16, #tpu.memory_space<vmem>>, %arg6: memref<128x128xf32, #tpu.memory_space<vmem>>, %arg7: memref<1x128xf32, #tpu.memory_space<vmem>>, %arg8: memref<1x128x128xbf16, #tpu.memory_space<vmem>>, %arg9: memref<8x128xf32, #tpu.memory_space<vmem>>, %arg10: memref<8x128xf32, #tpu.memory_space<vmem>>, %arg11: memref<8x128xf32, #tpu.memory_space<vmem>>, %arg12: memref<128x128xbf16, #tpu.memory_space<vmem>>) attributes {dimension_semantics = [#tpu.dimension_semantics<arbitrary>], iteration_bounds = array<i64: 2>, scalar_prefetch = 0 : i64, scratch_operands = 1 : i64, tpu.core_type = #tpu.core_type<tc>, window_params = [{pipeline_mode = #tpu.pipeline_mode<synchronous>, transform_indices = @transform_0, window_bounds = array<i64: 128, 128>}, {pipeline_mode = #tpu.pipeline_mode<synchronous>, transform_indices = @transform_1, window_bounds = array<i64: 128, 128>}, {transform_indices = @transform_2, window_bounds = array<i64: 1, 128, 128>}, {transform_indices = @transform_3, window_bounds = array<i64: 1, 1, 128>}, {pipeline_mode = #tpu.pipeline_mode<synchronous>, transform_indices = @transform_4, window_bounds = array<i64: 8, 128>}, {pipeline_mode = #tpu.pipeline_mode<synchronous>, transform_indices = @transform_5, window_bounds = array<i64: 128, 128>}, {pipeline_mode = #tpu.pipeline_mode<synchronous>, transform_indices = @transform_6, window_bounds = array<i64: 1, 128>}, {transform_indices = @transform_7, window_bounds = array<i64: 1, 128, 128>}, {pipeline_mode = #tpu.pipeline_mode<synchronous>, transform_indices = @transform_8, window_bounds = array<i64: 8, 128>}, {pipeline_mode = #tpu.pipeline_mode<synchronous>, transform_indices = @transform_9, window_bounds = array<i64: 8, 128>}, {pipeline_mode = #tpu.pipeline_mode<synchronous>, transform_indices = @transform_10, window_bounds = array<i64: 8, 128>}]} {
    %c0_i32 = arith.constant 0 : i32
    %0 = arith.cmpi eq, %arg0, %c0_i32 : i32
    %1 = arith.extui %0 : i1 to i32
    %c0_i32_0 = arith.constant 0 : i32
    %2 = arith.cmpi ne, %1, %c0_i32_0 : i32
    scf.if %2 {
      %c0_18 = arith.constant 0 : index
      %c0_19 = arith.constant 0 : index
      %26 = vector.load %arg2[%c0_18, %c0_19] : memref<128x128xbf16, #tpu.memory_space<vmem>>, vector<128x128xbf16>
      %c0_20 = arith.constant 0 : index
      %c0_21 = arith.constant 0 : index
      %27 = vector.load %arg12[%c0_20, %c0_21] : memref<128x128xbf16, #tpu.memory_space<vmem>>, vector<128x128xbf16>
      tpu.vector_store %arg12[%c0_20, %c0_21], %26 {strides = array<i32>} : memref<128x128xbf16, #tpu.memory_space<vmem>>, vector<128x128xbf16>,
    } else {
    }
    %c0 = arith.constant 0 : index
    %c0_1 = arith.constant 0 : index
    %3 = vector.load %arg1[%c0, %c0_1] : memref<128x128xbf16, #tpu.memory_space<vmem>>, vector<128x128xbf16>
    %c0_2 = arith.constant 0 : index
    %c0_3 = arith.constant 0 : index
    %4 = vector.load %arg12[%c0_2, %c0_3] : memref<128x128xbf16, #tpu.memory_space<vmem>>, vector<128x128xbf16>
    %cst = arith.constant dense<0.000000e+00> : vector<128x128xf32>
    %5 = tpu.matmul %3, %4, %cst {dimension_numbers = #tpu.dot_dimension_numbers<[1], [0], [0], [1], [0, 0, 1, 1], [], []>} : vector<128x128xbf16>, vector<128x128xbf16>, vector<128x128xf32> -> vector<128x128xf32>
    %6 = arith.truncf %5 : vector<128x128xf32> to vector<128x128xbf16>
    %c0_4 = arith.constant 0 : index
    %c0_5 = arith.constant 0 : index
    %c0_6 = arith.constant 0 : index
    %7 = vector.load %arg3[%c0_4, %c0_5, %c0_6] : memref<1x128x128xbf16, #tpu.memory_space<vmem>>, vector<1x128x128xbf16>
    %8 = vector.shape_cast %7 : vector<1x128x128xbf16> to vector<128x128xbf16>
    %cst_7 = arith.constant dense<0.000000e+00> : vector<128x128xf32>
    %9 = tpu.matmul %6, %8, %cst_7 {dimension_numbers = #tpu.dot_dimension_numbers<[1], [0], [0], [1], [0, 0, 1, 1], [], []>} : vector<128x128xbf16>, vector<128x128xbf16>, vector<128x128xf32> -> vector<128x128xf32>
    %c0_8 = arith.constant 0 : index
    %c0_9 = arith.constant 0 : index
    %c0_10 = arith.constant 0 : index
    %10 = vector.load %arg4[%c0_8, %c0_9, %c0_10] : memref<1x1x128xf32, #tpu.memory_space<vmem>>, vector<1x1x128xf32>
    %11 = vector.shape_cast %10 : vector<1x1x128xf32> to vector<1x128xf32>
    %12 = vector.broadcast %11 : vector<1x128xf32> to vector<128x128xf32>
    %13 = arith.addf %9, %12 : vector<128x128xf32>
    %cst_11 = arith.constant 0.000000e+00 : f32
    %14 = vector.broadcast %cst_11 : f32 to vector<128x128xf32>
    %15 = arith.maximumf %13, %14 : vector<128x128xf32>
    %16 = arith.truncf %15 : vector<128x128xf32> to vector<128x128xbf16>
    %c1_i32 = arith.constant 1 : i32
    %17 = arith.cmpi slt, %arg0, %c1_i32 : i32
    %18 = arith.extui %17 : i1 to i32
    %c0_i32_12 = arith.constant 0 : i32
    %19 = arith.cmpi ne, %18, %c0_i32_12 : i32
    scf.if %19 {
      %c0_18 = arith.constant 0 : index
      %c0_19 = arith.constant 0 : index
      %26 = vector.load %arg12[%c0_18, %c0_19] : memref<128x128xbf16, #tpu.memory_space<vmem>>, vector<128x128xbf16>
      tpu.vector_store %arg12[%c0_18, %c0_19], %16 {strides = array<i32>} : memref<128x128xbf16, #tpu.memory_space<vmem>>, vector<128x128xbf16>,
    } else {
    }
    %c0_13 = arith.constant 0 : index
    %c0_14 = arith.constant 0 : index
    %c0_15 = arith.constant 0 : index
    %20 = vector.load %arg8[%c0_13, %c0_14, %c0_15] : memref<1x128x128xbf16, #tpu.memory_space<vmem>>, vector<1x128x128xbf16>
    %21 = vector.shape_cast %20 : vector<1x128x128xbf16> to vector<128x128xbf16>
    %22 = vector.shape_cast %16 : vector<128x128xbf16> to vector<1x128x128xbf16>
    tpu.vector_store %arg8[%c0_13, %c0_14, %c0_15], %22 {strides = array<i32>} : memref<1x128x128xbf16, #tpu.memory_space<vmem>>, vector<1x128x128xbf16>,
    %c1_i32_16 = arith.constant 1 : i32
    %23 = arith.cmpi eq, %arg0, %c1_i32_16 : i32
    %24 = arith.extui %23 : i1 to i32
    %c0_i32_17 = arith.constant 0 : i32
    %25 = arith.cmpi ne, %24, %c0_i32_17 : i32
    scf.if %25 {
      %c0_18 = arith.constant 0 : index
      %c0_19 = arith.constant 0 : index
      %26 = vector.load %arg5[%c0_18, %c0_19] : memref<8x128xbf16, #tpu.memory_space<vmem>>, vector<8x128xbf16>
      %cst_20 = arith.constant dense<0.000000e+00> : vector<8x128xf32>
      %27 = tpu.matmul %26, %16, %cst_20 {dimension_numbers = #tpu.dot_dimension_numbers<[1], [0], [0], [1], [0, 0, 1, 1], [], []>} : vector<8x128xbf16>, vector<128x128xbf16>, vector<8x128xf32> -> vector<8x128xf32>
      %c0_21 = arith.constant 0 : index
      %c0_22 = arith.constant 0 : index
      %28 = vector.load %arg6[%c0_21, %c0_22] : memref<128x128xf32, #tpu.memory_space<vmem>>, vector<128x128xf32>
      %cst_23 = arith.constant dense<0.000000e+00> : vector<8x128xf32>
      %29 = tpu.matmul %27, %28, %cst_23 {dimension_numbers = #tpu.dot_dimension_numbers<[1], [0], [0], [1], [0, 0, 1, 1], [], []>} : vector<8x128xf32>, vector<128x128xf32>, vector<8x128xf32> -> vector<8x128xf32>
      %c0_24 = arith.constant 0 : index
      %c0_25 = arith.constant 0 : index
      %30 = vector.load %arg7[%c0_24, %c0_25] : memref<1x128xf32, #tpu.memory_space<vmem>>, vector<1x128xf32>
      %31 = vector.broadcast %30 : vector<1x128xf32> to vector<8x128xf32>
      %32 = arith.addf %29, %31 : vector<8x128xf32>
      %cst_26 = arith.constant 0.000000e+00 : f32
      %33 = vector.broadcast %cst_26 : f32 to vector<8x128xf32>
      %34 = arith.maximumf %32, %33 : vector<8x128xf32>
      %35 = tpu.iota {dimensions = array<i32: 1>} : vector<8x128xi32>
      %c4_i32 = arith.constant 4 : i32
      %36 = vector.broadcast %c4_i32 : i32 to vector<8x128xi32>
      %37 = arith.cmpi slt, %35, %36 : vector<8x128xi32>
      %cst_27 = arith.constant -3.40282347E+38 : f32
      %38 = vector.broadcast %cst_27 : f32 to vector<8x128xf32>
      %39 = arith.select %37, %34, %38 : vector<8x128xi1>, vector<8x128xf32>
      %cst_28 = arith.constant dense<0xFF800000> : vector<8xf32>
      %40 = vector.multi_reduction <maximumf>, %39, %cst_28 [1] : vector<8x128xf32> to vector<8xf32>
      %41 = vector.shape_cast %40 : vector<8xf32> to vector<8x1xf32>
      %42 = vector.broadcast %41 : vector<8x1xf32> to vector<8x128xf32>
      %43 = arith.subf %34, %42 : vector<8x128xf32>
      %44 = math.exp %43 : vector<8x128xf32>
      %cst_29 = arith.constant 0.000000e+00 : f32
      %45 = vector.broadcast %cst_29 : f32 to vector<8x128xf32>
      %46 = arith.select %37, %44, %45 : vector<8x128xi1>, vector<8x128xf32>
      %cst_30 = arith.constant dense<0.000000e+00> : vector<8xf32>
      %47 = vector.multi_reduction <add>, %46, %cst_30 [1] : vector<8x128xf32> to vector<8xf32>
      %48 = vector.shape_cast %47 : vector<8xf32> to vector<8x1xf32>
      %49 = tpu.reciprocal %48 : vector<8x1xf32> -> vector<8x1xf32>
      %50 = vector.broadcast %49 : vector<8x1xf32> to vector<8x128xf32>
      %51 = arith.mulf %46, %50 : vector<8x128xf32>
      %c0_31 = arith.constant 0 : index
      %c0_32 = arith.constant 0 : index
      %52 = vector.load %arg9[%c0_31, %c0_32] : memref<8x128xf32, #tpu.memory_space<vmem>>, vector<8x128xf32>
      tpu.vector_store %arg9[%c0_31, %c0_32], %27 {strides = array<i32>} : memref<8x128xf32, #tpu.memory_space<vmem>>, vector<8x128xf32>,
      %c0_33 = arith.constant 0 : index
      %c0_34 = arith.constant 0 : index
      %53 = vector.load %arg10[%c0_33, %c0_34] : memref<8x128xf32, #tpu.memory_space<vmem>>, vector<8x128xf32>
      tpu.vector_store %arg10[%c0_33, %c0_34], %34 {strides = array<i32>} : memref<8x128xf32, #tpu.memory_space<vmem>>, vector<8x128xf32>,
      %c0_35 = arith.constant 0 : index
      %c0_36 = arith.constant 0 : index
      %54 = vector.load %arg11[%c0_35, %c0_36] : memref<8x128xf32, #tpu.memory_space<vmem>>, vector<8x128xf32>
      tpu.vector_store %arg11[%c0_35, %c0_36], %51 {strides = array<i32>} : memref<8x128xf32, #tpu.memory_space<vmem>>, vector<8x128xf32>,
    } else {
    }
    return
  }
  func.func @transform_0(%arg0: i32) -> (i32, i32) {
    %c0_i32 = arith.constant 0 : i32
    %c0_i32_0 = arith.constant 0 : i32
    %c0_i32_1 = arith.constant 0 : i32
    return %c0_i32, %c0_i32_0 : i32, i32
  }
  func.func @transform_1(%arg0: i32) -> (i32, i32) {
    %c0_i32 = arith.constant 0 : i32
    %c0_i32_0 = arith.constant 0 : i32
    %c0_i32_1 = arith.constant 0 : i32
    return %c0_i32, %c0_i32_0 : i32, i32
  }
  func.func @transform_2(%arg0: i32) -> (i32, i32, i32) {
    %c0_i32 = arith.constant 0 : i32
    %c0_i32_0 = arith.constant 0 : i32
    %c0_i32_1 = arith.constant 0 : i32
    return %arg0, %c0_i32, %c0_i32_0 : i32, i32, i32
  }
  func.func @transform_3(%arg0: i32) -> (i32, i32, i32) {
    %c0_i32 = arith.constant 0 : i32
    %c0_i32_0 = arith.constant 0 : i32
    %c0_i32_1 = arith.constant 0 : i32
    return %arg0, %c0_i32, %c0_i32_0 : i32, i32, i32
  }
  func.func @transform_4(%arg0: i32) -> (i32, i32) {
    %c0_i32 = arith.constant 0 : i32
    %c0_i32_0 = arith.constant 0 : i32
    %c0_i32_1 = arith.constant 0 : i32
    return %c0_i32, %c0_i32_0 : i32, i32
  }
  func.func @transform_5(%arg0: i32) -> (i32, i32) {
    %c0_i32 = arith.constant 0 : i32
    %c0_i32_0 = arith.constant 0 : i32
    %c0_i32_1 = arith.constant 0 : i32
    return %c0_i32, %c0_i32_0 : i32, i32
  }
  func.func @transform_6(%arg0: i32) -> (i32, i32) {
    %c0_i32 = arith.constant 0 : i32
    %c0_i32_0 = arith.constant 0 : i32
    %c0_i32_1 = arith.constant 0 : i32
    return %c0_i32, %c0_i32_0 : i32, i32
  }
  func.func @transform_7(%arg0: i32) -> (i32, i32, i32) {
    %c0_i32 = arith.constant 0 : i32
    %c0_i32_0 = arith.constant 0 : i32
    %c0_i32_1 = arith.constant 0 : i32
    return %arg0, %c0_i32, %c0_i32_0 : i32, i32, i32
  }
  func.func @transform_8(%arg0: i32) -> (i32, i32) {
    %c0_i32 = arith.constant 0 : i32
    %c0_i32_0 = arith.constant 0 : i32
    %c0_i32_1 = arith.constant 0 : i32
    return %c0_i32, %c0_i32_0 : i32, i32
  }
  func.func @transform_9(%arg0: i32) -> (i32, i32) {
    %c0_i32 = arith.constant 0 : i32
    %c0_i32_0 = arith.constant 0 : i32
    %c0_i32_1 = arith.constant 0 : i32
    return %c0_i32, %c0_i32_0 : i32, i32
  }
  func.func @transform_10(%arg0: i32) -> (i32, i32) {
    %c0_i32 = arith.constant 0 : i32
    %c0_i32_0 = arith.constant 0 : i32
    %c0_i32_1 = arith.constant 0 : i32
    return %c0_i32, %c0_i32_0 : i32, i32
  }
}

</mosaic_0001>

<bundles_post_ra>
// kernel: tpu_custom_call.1
= control target key start
LH: loop header
LB: loop body
LE: loop exit
PB: predicated region body
PF: predicated region fallthrough
CT: control target
= control target key end

     0   :  { %6 = vsyncpa [#allocation3], 0  ;;  %s103_s0 = inlined_call_operand.hbm [shape: f32[8,128], index: 0, kind: input, shape index: {}]   ;;  %s104_s1 = inlined_call_operand.hbm [shape: f32[8,128], index: 1, kind: output, shape index: {}]  }
   0x1   :  { %7 = vsyncpa [#allocation4], 0  ;;  %s85_s6 = smov [#allocation2]  }
   0x2   :  { %s14_s7 = sshll.u32 %s85_s6, 4  ;;  %s15_s7 = int_to_ptr.vmem [resolvable:$true] %s14_s7 }
   0x3   :  { %s49_s8 = scalar_lea.vmem %s15_s7, 128  ;;  %p54_p1 = scmp.lt.s32.totalorder %s15_s7, %s15_s7 }
   0x4   :  { %p50_p0 = scmp.ne.s32.totalorder %s15_s7, %s49_s8  ;;  %p55_p2 = scmp.lt.s32.totalorder %s49_s8, %s49_s8 }
   0x6   :  { %p56_p3 = por %p55_p2, %p54_p1 }
   0x8   :  { %p57_p4 = pnand %p56_p3, %p50_p0 }
   0xa   :  { %60 = shalt.err (!%p57_p4)
}
   0xb   :  { %17 = dma.hbm_to_vmem [thread:$0]  %s103_s0, 128, %s15_s7, [#allocation3]  }
   0xc   :  { %81 = dma.done.wait [#allocation3], 128  }
   0xd   :  { %82 = vsyncadd [#allocation3], 4294967168  ;;  %s86_s11 = smov [#allocation5]   ;;  %v21_v0 = vld [vmem:[#allocation2] sm:$0xff] }
   0xe   :  { %s30_s12 = sshll.u32 %s86_s11, 4  ;;  %v22_v1 = vadd.f32 1.0, %v21_v0  ;;  %s31_s12 = int_to_ptr.vmem [resolvable:$true] %s30_s12 }
   0xf   :  { %s61_s13 = scalar_lea.vmem %s31_s12, 128  ;;  %p66_p6 = scmp.lt.s32.totalorder %s31_s12, %s31_s12 }
  0x10   :  { %23 = vst [vmem:[#allocation5] sm:$0xff] %v22_v1  ;;  %p62_p5 = scmp.ne.s32.totalorder %s31_s12, %s61_s13  ;;  %p67_p7 = scmp.lt.s32.totalorder %s61_s13, %s61_s13 }
  0x12   :  { %p68_p8 = por %p67_p7, %p66_p6 }
  0x14   :  { %p69_p9 = pnand %p68_p8, %p62_p5 }
  0x16   :  { %72 = shalt.err (!%p69_p9)
}
  0x17   :  { %33 = dma.vmem_to_hbm [thread:$0]  %s31_s12, 128, %s104_s1, [#allocation4]  }
  0x18   :  { %83 = dma.done.wait [#allocation4], 128  }
  0x19   :  { %84 = vsyncadd [#allocation4], 4294967168 }
  0x1a   :  { %37 = vsyncpa [#allocation3], 1 }
  0x1b   :  { %38 = vsyncpa [#allocation4], 1 }

// kernel: gcn_plus_gap_forward.1
= control target key start
LH: loop header
LB: loop body
LE: loop exit
PB: predicated region body
PF: predicated region fallthrough
CT: control target
= control target key end

     0   :  { %s1694_s13 = smov 0   ;;  %s1912_s0 = inlined_call_operand.vmem [shape: bf16[128,128], index: 0, kind: input, shape index: {}]   ;;  %s1913_s1 = inlined_call_operand.vmem [shape: bf16[128,128], index: 1, kind: input, shape index: {}]   ;;  %s1914_s2 = inlined_call_operand.vmem [shape: bf16[2,128,128], index: 2, kind: input, shape index: {}]   ;;  %s1915_s3 = inlined_call_operand.vmem [shape: f32[2,1,128], index: 3, kind: input, shape index: {}]   ;;  %s1916_s4 = inlined_call_operand.vmem [shape: bf16[8,128], index: 4, kind: input, shape index: {}]   ;;  %s1917_s5 = inlined_call_operand.vmem [shape: f32[128,128], index: 5, kind: input, shape index: {}]   ;;  %s1918_s6 = inlined_call_operand.vmem [shape: f32[1,128], index: 6, kind: input, shape index: {}]   ;;  %s1919_s7 = inlined_call_operand.vmem [shape: bf16[2,128,128], index: 7, kind: output, shape index: {0}]   ;;  %s1920_s8 = inlined_call_operand.vmem [shape: f32[8,128], index: 8, kind: output, shape index: {1}]   ;;  %s1921_s9 = inlined_call_operand.vmem [shape: f32[8,128], index: 9, kind: output, shape index: {2}]   ;;  %s1922_s10 = inlined_call_operand.vmem [shape: f32[8,128], index: 10, kind: output, shape index: {3}]  }
   0x1 LB: > { %s1700_s14 = sadd.s32 4294967295, %s1635_s13   ;;  %p1218_p0 = scmp.ge.s32.totalorder %s1635_s13, 1  ;;  %s1635_s13 = sphi %s1694_s13, %s21_s13  }
   0x2   : > { %p312_p1 = scmp.lt.s32.totalorder %s1635_s13, 3 }
   0x4   : > { %p313_p2 = pnand %p1218_p0, %p312_p1 }
   0x5   : > { %p353_p3 = scmp.lt.s32.totalorder (!%p313_p2), %s1700_s14, 1  ;;  %p1223_p4 = scmp.ne.s32.totalorder (!%p313_p2), %s1700_s14, 0 }
   0x6   : > { %316 = sbr.rel (%p313_p2) target bundleno = 1238 (0x4d6), region = 48 }
   0xb   : > { %s1706_s15 = scalar_select %p353_p3, %s1700_s14, 1 }
   0xc   : > { %370 = sbr.rel (%p1223_p4) target bundleno = 22 (0x16), region = 52 }
   0xd   : > { %s1286_s16 = sshll.u32 %s1706_s15, 6  ;;  %s360_s19 = scalar_lea.vmem %s1915_s3, %s1706_s15 }
   0xe   : > { %s1716_s22 = scalar_lea.vmem %s1914_s2, %s1286_s16  ;;  %s1721_s25 = scalar_lea.vmem %s1919_s7, %s1286_s16 }
  0x11   : > { %v371_v0 = vld [vmem:[%s1913_s1] sm:$0xff]   ;;  %v373_v1 = vld [vmem:[%s1913_s1 + $0x8] sm:$0xff]   ;;  %v375_v2 = vld [vmem:[%s1913_s1 + $0x10] sm:$0xff]  }
  0x12   : > { %387 = vst [vmem:[#allocation2] sm:$0xff] %v371_v0   ;;  %389 = vst [vmem:[#allocation2 + $0x8] sm:$0xff] %v373_v1   ;;  %v377_v3 = vld [vmem:[%s1913_s1 + $0x18] sm:$0xff]   ;;  %v379_v4 = vld [vmem:[%s1913_s1 + $0x20] sm:$0xff]  }
  0x13   : > { %391 = vst [vmem:[#allocation2 + $0x10] sm:$0xff] %v375_v2   ;;  %v381_v5 = vld [vmem:[%s1913_s1 + $0x28] sm:$0xff]   ;;  %393 = vst [vmem:[#allocation2 + $0x18] sm:$0xff] %v377_v3   ;;  %v383_v6 = vld [vmem:[%s1913_s1 + $0x30] sm:$0xff]  }
  0x14   : > { %395 = vst [vmem:[#allocation2 + $0x20] sm:$0xff] %v379_v4   ;;  %397 = vst [vmem:[#allocation2 + $0x28] sm:$0xff] %v381_v5   ;;  %v385_v7 = vld [vmem:[%s1913_s1 + $0x38] sm:$0xff]  }
  0x15   : > { %399 = vst [vmem:[#allocation2 + $0x30] sm:$0xff] %v383_v6   ;;  %401 = vst [vmem:[#allocation2 + $0x38] sm:$0xff] %v385_v7  }
  0x16 PF: > { %v1609_v12 = vld [vmem:[%s1912_s0] sm:$0xff]   ;;  %v1617_v15 = vld [vmem:[%s1716_s22 + $0x38] sm:$0xff]   ;;  %v1618_v16 = vld [vmem:[%s1716_s22 + $0x30] sm:$0xff]   ;;  %p1249_p5 = scmp.ge.s32.totalorder %s1700_s14, 1 }
  0x17   : > { %1488 = vmatprep.mubr.bf16.mxu0 %v1609_v12  ;;  %1504 = vmatprep.subr.bf16.mxu1 %v1617_v15  ;;  %v1619_v18 = vld [vmem:[%s1716_s22 + $0x28] sm:$0xff]   ;;  %v1620_v20 = vld [vmem:[%s1716_s22 + $0x20] sm:$0xff]   ;;  %v1621_v21 = vld [vmem:[%s1716_s22 + $0x18] sm:$0xff]  }
  0x18   : > { %1505 = vmatpush3.bf16.msra.mxu1 %v1617_v15  ;;  %v1610_v22 = vld [vmem:[%s1912_s0 + $0x8] sm:$0xff]   ;;  %v1611_v23 = vld [vmem:[%s1912_s0 + $0x10] sm:$0xff]   ;;  %v1612_v25 = vld [vmem:[%s1912_s0 + $0x18] sm:$0xff]  }
  0x19   : > { %v1607_v17 = vld [vmem:[#allocation2 + $0x8] sm:$0xff]   ;;  %1506 = vmatprep.subr.bf16.mxu1 %v1618_v16  ;;  %v1608_v19 = vld [vmem:[#allocation2] sm:$0xff]   ;;  %v1622_v24 = vld [vmem:[%s1716_s22 + $0x10] sm:$0xff]  }
  0x1a   : > { %v1605_v13 = vld [vmem:[#allocation2 + $0x18] sm:$0xff]   ;;  %v1606_v14 = vld [vmem:[#allocation2 + $0x10] sm:$0xff]   ;;  %v1613_v26 = vld [vmem:[%s1912_s0 + $0x20] sm:$0xff]  }
  0x1b   : > { %v1603_v10 = vld [vmem:[#allocation2 + $0x28] sm:$0xff]   ;;  %v1604_v11 = vld [vmem:[#allocation2 + $0x20] sm:$0xff]   ;;  %v1615_v28 = vld [vmem:[%s1912_s0 + $0x30] sm:$0xff]  }
  0x1c   : > { %v1601_v8 = vld [vmem:[#allocation2 + $0x38] sm:$0xff]   ;;  %v1602_v9 = vld [vmem:[#allocation2 + $0x30] sm:$0xff]   ;;  %1507 = vmatpush3.bf16.msra.mxu1 %v1618_v16  ;;  %v1614_v27 = vld [vmem:[%s1912_s0 + $0x28] sm:$0xff]  }
  0x1d   : > { %1472 = vmatprep.subr.bf16.mxu0 %v1601_v8  ;;  %1508 = vmatprep.subr.bf16.mxu1 %v1619_v18  ;;  %v1616_v29 = vld [vmem:[%s1912_s0 + $0x38] sm:$0xff]   ;;  %v1623_v30 = vld [vmem:[%s1716_s22 + $0x8] sm:$0xff]   ;;  %v1624_v31 = vld [vmem:[%s1716_s22] sm:$0xff]  }
  0x1e   : > { %1473 = vmatpush3.bf16.msra.mxu0 %v1601_v8  ;;  %v1240_v57 = vld [vmem:[%s360_s19] ss:$0 sm:$0xff] }
  0x1f   : > { %1474 = vmatprep.subr.bf16.mxu0 %v1602_v9 }
  0x20   : > { %1509 = vmatpush3.bf16.msra.mxu1 %v1619_v18 }
  0x21   : > { %1510 = vmatprep.subr.bf16.mxu1 %v1620_v20 }
  0x22   : > { %1475 = vmatpush3.bf16.msra.mxu0 %v1602_v9 }
  0x23   : > { %1476 = vmatprep.subr.bf16.mxu0 %v1603_v10 }
  0x24   : > { %1511 = vmatpush3.bf16.msra.mxu1 %v1620_v20 }
  0x25   : > { %1512 = vmatprep.subr.bf16.mxu1 %v1621_v21 }
  0x26   : > { %1477 = vmatpush3.bf16.msra.mxu0 %v1603_v10 }
  0x27   : > { %1478 = vmatprep.subr.bf16.mxu0 %v1604_v11 }
  0x28   : > { %1513 = vmatpush3.bf16.msra.mxu1 %v1621_v21 }
  0x29   : > { %1514 = vmatprep.subr.bf16.mxu1 %v1622_v24 }
  0x2a   : > { %1479 = vmatpush3.bf16.msra.mxu0 %v1604_v11 }
  0x2b   : > { %1480 = vmatprep.subr.bf16.mxu0 %v1605_v13 }
  0x2c   : > { %1515 = vmatpush3.bf16.msra.mxu1 %v1622_v24 }
  0x2d   : > { %1516 = vmatprep.subr.bf16.mxu1 %v1623_v30 }
  0x2e   : > { %1481 = vmatpush3.bf16.msra.mxu0 %v1605_v13 }
  0x2f   : > { %1482 = vmatprep.subr.bf16.mxu0 %v1606_v14 }
  0x30   : > { %1517 = vmatpush3.bf16.msra.mxu1 %v1623_v30 }
  0x31   : > { %1518 = vmatprep.subr.bf16.mxu1 %v1624_v31 }
  0x32   : > { %1483 = vmatpush3.bf16.msra.mxu0 %v1606_v14 }
  0x33   : > { %1484 = vmatprep.subr.bf16.mxu0 %v1607_v17 }
  0x34   : > { %1519 = vmatpush3.bf16.msra.mxu1 %v1624_v31 }
  0x36   : > { %1485 = vmatpush3.bf16.msra.mxu0 %v1607_v17 }
  0x37   : > { %1486 = vmatprep.subr.bf16.mxu0 %v1608_v19 }
  0x3a   : > { %1487 = vmatpush3.bf16.msra.mxu0 %v1608_v19 }
  0x3d   : > { %1489 = vmatmul.mubr.bf16.vlgmr.msra.gmra.mxu0 %v1610_v22 }
  0x3e   : > { %1492 = vmatprep.mubr.bf16.mxu0 %v1611_v23 }
  0x45   : > { %1493 = vmatmul.mubr.bf16.gmra.mxu0 %v1612_v25 }
  0x46   : > { %1496 = vmatprep.mubr.bf16.mxu0 %v1613_v26 }
  0x4d   : > { %1497 = vmatmul.mubr.bf16.gmra.mxu0 %v1614_v27 }
  0x4e   : > { %1500 = vmatprep.mubr.bf16.mxu0 %v1615_v28 }
  0x55   : > { %1501 = vmatmul.mubr.bf16.gmra.mxu0 %v1616_v29 }
  0xfd   : > { %v1490_v32 = vpop.f32.mrf.mxu0 }
  0xff   : > { %v565_v33 = vpop.f32.mrf.mxu0 }
 0x101   : > { %v1491_v34 = vpop.f32.mrf.mxu0 }
 0x102   : > { %v629_v37 = vpack.c.bf16 %v1491_v34, %v1490_v32 }
 0x103   : > { %v568_v35 = vpop.f32.mrf.mxu0 }
 0x104   : > { %v628_v36 = vpack.c.bf16 %v568_v35, %v565_v33 }
 0x105   : > { %v1494_v38 = vpop.f32.mrf.mxu0 }
 0x106   : > { %1520 = vmatprep.mubr.bf16.mxu1 %v628_v36 }
 0x107   : > { %v581_v39 = vpop.f32.mrf.mxu0  ;;  %1521 = vmatmul.mubr.bf16.vlgmr.msra.gmra.mxu1 %v629_v37 }
 0x109   : > { %v1495_v40 = vpop.f32.mrf.mxu0 }
 0x10a   : > { %v631_v43 = vpack.c.bf16 %v1495_v40, %v1494_v38 }
 0x10b   : > { %v584_v41 = vpop.f32.mrf.mxu0 }
 0x10c   : > { %v630_v42 = vpack.c.bf16 %v584_v41, %v581_v39 }
 0x10d   : > { %v1498_v44 = vpop.f32.mrf.mxu0 }
 0x10e   : > { %1524 = vmatprep.mubr.bf16.mxu1 %v630_v42 }
 0x10f   : > { %v597_v45 = vpop.f32.mrf.mxu0  ;;  %1525 = vmatmul.mubr.bf16.gmra.mxu1 %v631_v43 }
 0x111   : > { %v1499_v46 = vpop.f32.mrf.mxu0 }
 0x112   : > { %v633_v49 = vpack.c.bf16 %v1499_v46, %v1498_v44 }
 0x113   : > { %v600_v47 = vpop.f32.mrf.mxu0 }
 0x114   : > { %v632_v48 = vpack.c.bf16 %v600_v47, %v597_v45 }
 0x115   : > { %v1502_v50 = vpop.f32.mrf.mxu0 }
 0x116   : > { %1528 = vmatprep.mubr.bf16.mxu1 %v632_v48 }
 0x117   : > { %v613_v51 = vpop.f32.mrf.mxu0  ;;  %1529 = vmatmul.mubr.bf16.gmra.mxu1 %v633_v49 }
 0x119   : > { %v1503_v52 = vpop.f32.mrf.mxu0 }
 0x11a   : > { %v635_v55 = vpack.c.bf16 %v1503_v52, %v1502_v50 }
 0x11b   : > { %v616_v53 = vpop.f32.mrf.mxu0 }
 0x11c   : > { %v634_v54 = vpack.c.bf16 %v616_v53, %v613_v51 }
 0x11e   : > { %1532 = vmatprep.mubr.bf16.mxu1 %v634_v54 }
 0x11f   : > { %1533 = vmatmul.mubr.bf16.gmra.mxu1 %v635_v55 }
 0x1c7   : > { %v1522_v56 = vpop.f32.mrf.mxu1 }
 0x1c8   : > { %v750_v59 = vadd.f32 %v1522_v56, %v1240_v57 }
 0x1c9   : > { %v741_v58 = vpop.f32.mrf.mxu1 }
 0x1ca   : > { %v742_v61 = vadd.f32 %v1240_v57, %v741_v58  ;;  %v806_v0 = vmax.f32 %v750_v59, 0.0 }
 0x1cb   : > { %v1523_v60 = vpop.f32.mrf.mxu1 }
 0x1cc   : > { %v753_v62 = vadd.f32 %v1523_v60, %v1240_v57  ;;  %v804_v4 = vmax.f32 %v742_v61, 0.0 }
 0x1cd   : > { %v744_v63 = vpop.f32.mrf.mxu1 }
 0x1ce   : > { %v807_v1 = vmax.f32 %v753_v62, 0.0  ;;  %v745_v2 = vadd.f32 %v1240_v57, %v744_v63 }
 0x1cf   : > { %v1526_v3 = vpop.f32.mrf.mxu1 }
 0x1d0   : > { %v1785_v5 = vpack.c.bf16 %v807_v1, %v806_v0  ;;  %v805_v6 = vmax.f32 %v745_v2, 0.0  ;;  %v766_v9 = vadd.f32 %v1526_v3, %v1240_v57 }
 0x1d1   : > { %v757_v7 = vpop.f32.mrf.mxu1 }
 0x1d2   : > { %v1787_v8 = vpack.c.bf16 %v805_v6, %v804_v4  ;;  %v758_v11 = vadd.f32 %v1240_v57, %v757_v7  ;;  %v810_v14 = vmax.f32 %v766_v9, 0.0 }
 0x1d3   : > { %v1527_v10 = vpop.f32.mrf.mxu1 }
 0x1d4   : > { %v769_v12 = vadd.f32 %v1527_v10, %v1240_v57  ;;  %v808_v18 = vmax.f32 %v758_v11, 0.0 }
 0x1d5   : > { %v760_v13 = vpop.f32.mrf.mxu1 }
 0x1d6   : > { %v811_v15 = vmax.f32 %v769_v12, 0.0  ;;  %v761_v16 = vadd.f32 %v1240_v57, %v760_v13 }
 0x1d7   : > { %v1530_v17 = vpop.f32.mrf.mxu1 }
 0x1d8   : > { %v1789_v19 = vpack.c.bf16 %v811_v15, %v810_v14  ;;  %v809_v20 = vmax.f32 %v761_v16, 0.0  ;;  %v782_v23 = vadd.f32 %v1530_v17, %v1240_v57 }
 0x1d9   : > { %v773_v21 = vpop.f32.mrf.mxu1 }
 0x1da   : > { %v1791_v22 = vpack.c.bf16 %v809_v20, %v808_v18  ;;  %v774_v25 = vadd.f32 %v1240_v57, %v773_v21  ;;  %v814_v28 = vmax.f32 %v782_v23, 0.0 }
 0x1db   : > { %v1531_v24 = vpop.f32.mrf.mxu1 }
 0x1dc   : > { %v785_v26 = vadd.f32 %v1531_v24, %v1240_v57  ;;  %v812_v32 = vmax.f32 %v774_v25, 0.0 }
 0x1dd   : > { %v776_v27 = vpop.f32.mrf.mxu1 }
 0x1de   : > { %v815_v29 = vmax.f32 %v785_v26, 0.0  ;;  %v777_v30 = vadd.f32 %v1240_v57, %v776_v27 }
 0x1df   : > { %v1534_v31 = vpop.f32.mrf.mxu1 }
 0x1e0   : > { %v825_v33 = vpack.c.bf16 %v815_v29, %v814_v28  ;;  %v813_v34 = vmax.f32 %v777_v30, 0.0  ;;  %v798_v37 = vadd.f32 %v1534_v31, %v1240_v57 }
 0x1e1   : > { %v789_v35 = vpop.f32.mrf.mxu1 }
 0x1e2   : > { %v1793_v36 = vpack.c.bf16 %v813_v34, %v812_v32  ;;  %v790_v39 = vadd.f32 %v1240_v57, %v789_v35  ;;  %v818_v42 = vmax.f32 %v798_v37, 0.0 }
 0x1e3   : > { %v1535_v38 = vpop.f32.mrf.mxu1 }
 0x1e4   : > { %v801_v40 = vadd.f32 %v1535_v38, %v1240_v57  ;;  %v816_v45 = vmax.f32 %v790_v39, 0.0 }
 0x1e5   : > { %v792_v41 = vpop.f32.mrf.mxu1 }
 0x1e6   : > { %v819_v43 = vmax.f32 %v801_v40, 0.0  ;;  %v793_v44 = vadd.f32 %v1240_v57, %v792_v41  ;;  %831 = sbr.rel (%p1249_p5) target bundleno = 495 (0x1ef), region = 56 }
 0x1e8   : > { %v827_v46 = vpack.c.bf16 %v819_v43, %v818_v42  ;;  %v817_v47 = vmax.f32 %v793_v44, 0.0 }
 0x1ea   : > { %v826_v48 = vpack.c.bf16 %v817_v47, %v816_v45 }
 0x1eb   : > { %1324 = vst [vmem:[#allocation2] sm:$0xff] %v1787_v8   ;;  %1400 = vst [vmem:[#allocation2 + $0x8] sm:$0xff] %v1785_v5  }
 0x1ec   : > { %1401 = vst [vmem:[#allocation2 + $0x10] sm:$0xff] %v1791_v22   ;;  %1402 = vst [vmem:[#allocation2 + $0x18] sm:$0xff] %v1789_v19  }
 0x1ed   : > { %1403 = vst [vmem:[#allocation2 + $0x20] sm:$0xff] %v1793_v36   ;;  %1404 = vst [vmem:[#allocation2 + $0x28] sm:$0xff] %v825_v33  }
 0x1ee   : > { %1405 = vst [vmem:[#allocation2 + $0x30] sm:$0xff] %v826_v48   ;;  %1406 = vst [vmem:[#allocation2 + $0x38] sm:$0xff] %v827_v46  }
 0x1ef PF: > { %1364 = vst [vmem:[%s1721_s25] sm:$0xff] %v1787_v8   ;;  %1407 = vst [vmem:[%s1721_s25 + $0x8] sm:$0xff] %v1785_v5   ;;  %p1282_p6 = scmp.ne.s32.totalorder %s1700_s14, 1 }
 0x1f0   : > { %1408 = vst [vmem:[%s1721_s25 + $0x10] sm:$0xff] %v1791_v22   ;;  %1409 = vst [vmem:[%s1721_s25 + $0x18] sm:$0xff] %v1789_v19  }
 0x1f1   : > { %1410 = vst [vmem:[%s1721_s25 + $0x20] sm:$0xff] %v1793_v36   ;;  %1411 = vst [vmem:[%s1721_s25 + $0x28] sm:$0xff] %v825_v33   ;;  %979 = sbr.rel (%p1282_p6) target bundleno = 1238 (0x4d6), region = 60 }
 0x1f2   : > { %1412 = vst [vmem:[%s1721_s25 + $0x30] sm:$0xff] %v826_v48   ;;  %1413 = vst [vmem:[%s1721_s25 + $0x38] sm:$0xff] %v827_v46  }
 0x1f6   : > { %v1036_v49 = vld [vmem:[%s1917_s5 + $0x78] sm:$0xff]  ;;  %v1637_v50 = vmov 0.0   ;;  %vm1638_vm0 = vmmov 0   ;;  %v1035_v51 = vld [vmem:[%s1917_s5 + $0x70] sm:$0xff]  ;;  %v1034_v52 = vld [vmem:[%s1917_s5 + $0x68] sm:$0xff]  ;;  %v1115_v7 = vlaneseq }
 0x1f7   : > { %1536 = vmatprep.subr.bf16.mxu0 %v1637_v50  ;;  %1552 = vmatprep.mubr.msk.bf16.mxu0 %vm1638_vm0, %v1637_v50  ;;  %v1033_v53 = vld [vmem:[%s1917_s5 + $0x60] sm:$0xff]  ;;  %v1032_v54 = vld [vmem:[%s1917_s5 + $0x58] sm:$0xff]  ;;  %v1031_v55 = vld [vmem:[%s1917_s5 + $0x50] sm:$0xff] }
 0x1f8   : > { %1537 = vmatpush3.bf16.msra.mxu0 %v827_v46  ;;  %1556 = vmatprep.subr.mxu1 %v1637_v50  ;;  %v1030_v56 = vld [vmem:[%s1917_s5 + $0x48] sm:$0xff]  ;;  %v1029_v57 = vld [vmem:[%s1917_s5 + $0x40] sm:$0xff]  ;;  %v1028_v58 = vld [vmem:[%s1917_s5 + $0x38] sm:$0xff]  ;;  %v1116_v9 = vand.u32 127, %v1115_v7 }
 0x1f9   : > { %1538 = vmatprep.subr.bf16.mxu0 %v1637_v50  ;;  %1557 = vmatpush3.msra.mxu1 %v1036_v49  ;;  %v1027_v59 = vld [vmem:[%s1917_s5 + $0x30] sm:$0xff]  ;;  %v1026_v60 = vld [vmem:[%s1917_s5 + $0x28] sm:$0xff]  ;;  %v1025_v61 = vld [vmem:[%s1917_s5 + $0x20] sm:$0xff] }
 0x1fa   : > { %1558 = vmatprep.subr.mxu1 %v1637_v50  ;;  %1588 = vmatprep.mubr.msk.f32.mxu1 %vm1638_vm0, %v1637_v50  ;;  %v1024_v62 = vld [vmem:[%s1917_s5 + $0x18] sm:$0xff]  ;;  %v1023_v63 = vld [vmem:[%s1917_s5 + $0x10] sm:$0xff]  ;;  %v1022_v0 = vld [vmem:[%s1917_s5 + $0x8] sm:$0xff]  ;;  %vm1117_vm1 = vcmp.lt.s32.totalorder %v1116_v9, 4 }
 0x1fb   : > { %1559 = vmatpush3.msra.mxu1 %v1035_v51  ;;  %v980_v1 = vld [vmem:[%s1916_s4] sm:$0xf] }
 0x1fc   : > { %1539 = vmatpush3.bf16.msra.mxu0 %v826_v48  ;;  %1560 = vmatprep.subr.mxu1 %v1637_v50  ;;  %v1021_v2 = vld [vmem:[%s1917_s5] sm:$0xff] }
 0x1fd   : > { %1540 = vmatprep.subr.bf16.mxu0 %v1637_v50  ;;  %1561 = vmatpush3.msra.mxu1 %v1034_v52 }
 0x1fe   : > { %1562 = vmatprep.subr.mxu1 %v1637_v50 }
 0x1ff   : > { %1563 = vmatpush3.msra.mxu1 %v1033_v53 }
 0x200   : > { %1541 = vmatpush3.bf16.msra.mxu0 %v825_v33  ;;  %1564 = vmatprep.subr.mxu1 %v1637_v50 }
 0x201   : > { %1542 = vmatprep.subr.bf16.mxu0 %v1637_v50  ;;  %1565 = vmatpush3.msra.mxu1 %v1032_v54 }
 0x202   : > { %1566 = vmatprep.subr.mxu1 %v1637_v50 }
 0x203   : > { %1567 = vmatpush3.msra.mxu1 %v1031_v55 }
 0x204   : > { %1543 = vmatpush3.bf16.msra.mxu0 %v1793_v36  ;;  %1568 = vmatprep.subr.mxu1 %v1637_v50 }
 0x205   : > { %1544 = vmatprep.subr.bf16.mxu0 %v1637_v50  ;;  %1569 = vmatpush3.msra.mxu1 %v1030_v56 }
 0x206   : > { %1570 = vmatprep.subr.mxu1 %v1637_v50 }
 0x207   : > { %1571 = vmatpush3.msra.mxu1 %v1029_v57 }
 0x208   : > { %1545 = vmatpush3.bf16.msra.mxu0 %v1789_v19  ;;  %1572 = vmatprep.subr.mxu1 %v1637_v50 }
 0x209   : > { %1546 = vmatprep.subr.bf16.mxu0 %v1637_v50  ;;  %1573 = vmatpush3.msra.mxu1 %v1028_v58 }
 0x20a   : > { %1574 = vmatprep.subr.mxu1 %v1637_v50 }
 0x20b   : > { %1575 = vmatpush3.msra.mxu1 %v1027_v59 }
 0x20c   : > { %1547 = vmatpush3.bf16.msra.mxu0 %v1791_v22  ;;  %1576 = vmatprep.subr.mxu1 %v1637_v50 }
 0x20d   : > { %1548 = vmatprep.subr.bf16.mxu0 %v1637_v50  ;;  %1577 = vmatpush3.msra.mxu1 %v1026_v60 }
 0x20e   : > { %1578 = vmatprep.subr.mxu1 %v1637_v50 }
 0x20f   : > { %1579 = vmatpush3.msra.mxu1 %v1025_v61 }
 0x210   : > { %1549 = vmatpush3.bf16.msra.mxu0 %v1785_v5  ;;  %1580 = vmatprep.subr.mxu1 %v1637_v50 }
 0x211   : > { %1550 = vmatprep.subr.bf16.mxu0 %v1637_v50  ;;  %1581 = vmatpush3.msra.mxu1 %v1024_v62 }
 0x212   : > { %1582 = vmatprep.subr.mxu1 %v1637_v50 }
 0x213   : > { %1583 = vmatpush3.msra.mxu1 %v1023_v63 }
 0x214   : > { %1551 = vmatpush3.bf16.msra.mxu0 %v1787_v8  ;;  %1584 = vmatprep.subr.mxu1 %v1637_v50  ;;  %v1283_v8 = vld [vmem:[%s1918_s6] ss:$0 sm:$0xff] }
 0x215   : > { %1585 = vmatpush3.msra.mxu1 %v1022_v0 }
 0x216   : > { %1586 = vmatprep.subr.mxu1 %v1637_v50 }
 0x217   : > { %1553 = vmatmul.mubr.bf16.vlgmr.msra.gmra.mxu0 %v980_v1  ;;  %1587 = vmatpush3.msra.mxu1 %v1021_v2 }
 0x2d7   : > { %v1015_v3 = vpop.f32.mrf.mxu0 }
 0x2d8   : > { %1129 = vst [vmem:[%s1920_s8] sm:$0xff] %v1015_v3  ;;  %1589 = vmatmul.mubr.f32.vlgmr.msra.gmra.mxu1 %v1015_v3 }
 0x2d9   : > { %v1554_v4 = vpop.f32.mrf.mxu0 }
 0x2db   : > { %v1018_v5 = vpop.f32.mrf.mxu0 }
 0x2dd   : > { %v1555_v6 = vpop.f32.mrf.mxu0 }
 0x398   : > { %v1110_v10 = vpop.f32.mrf.mxu1 }
 0x399   : > { %v1111_v11 = vadd.f32 %v1283_v8, %v1110_v10 }
 0x39a   : > { %v1590_v12 = vpop.f32.mrf.mxu1 }
 0x39b   : > { %v1114_v13 = vmax.f32 %v1111_v11, 0.0 }
 0x39d   : > { %1130 = vst [vmem:[%s1921_s9] sm:$0xff] %v1114_v13  ;;  %v1118_v14 = vsel %vm1117_vm1, %v1114_v13, -3.4028235e+38 }
 0x39e   : > { %1119 = vmax.xlane.f32.xlu0 %v1118_v14 }
 0x427   : > { %v1120_v15 = vpop.xlane.xlu0 %1119 }
 0x428   : > { %v1121_v16 = vsub.f32 %v1114_v13, %v1120_v15 }
 0x42a   : > { %v1122_v17 = vmul.f32 1.442695, %v1121_v16 }
 0x42c   : > { %1625 = vpow2.f32 %v1122_v17 }
 0x439   : > { %v1626_v18 = vpop.eup %1625 }
 0x43a   : > { %v1124_v19 = vsel %vm1117_vm1, %v1626_v18, 0.0 }
 0x43b   : > { %1125 = vadd.xlane.f32.xlu0 %v1124_v19 }
 0x4c4   : > { %v1126_v20 = vpop.xlane.xlu0 %1125 }
 0x4c5   : > { %1627 = vrcp.f32 %v1126_v20 }
 0x4d2   : > { %v1628_v21 = vpop.eup %1627 }
 0x4d3   : > { %v1128_v22 = vmul.f32 %v1628_v21, %v1124_v19 }
 0x4d5   : > { %1131 = vst [vmem:[%s1922_s10] sm:$0xff] %v1128_v22 }
 0x4d6 PF: > { %s21_s13 = sadd.s32 1, %s1635_s13  }
 0x4d7   : > { %p18_p7 = scmp.ge.s32.totalorder %s21_s13, 4  }
 0x4d9   :  { %20 = sbr.rel (!%p18_p7) target bundleno = 1 (0x1), region = 117 }

</bundles_post_ra>
